<compile_context>
chip_gen: v5e
topology: v5e:2x2
jax: 0.10.0
libtpu: 0.0.40
codegen_flags: <defaults>
</compile_context>

<pallas_src>
import jax
import jax.numpy as jnp
from jax.experimental import pallas as pl
from jax.experimental.pallas import tpu as pltpu

BN_EPS = 1e-5


def _toeplitz_conv_weight(w_hwio, W):
    """HWIO (3,3,Ci,Co) conv weight -> (3, (W+2)*Ci, W*Co) block-Toeplitz matrices.

    T[kh, (w+kw)*Ci + ci, w*Co + co] = w_hwio[kh, kw, ci, co], so that from a
    lane-dense zero-haloed activation row p[y, x*Ci + ci] a full output row
    out[y, w*Co + co] is one ((W+2)*Ci x W*Co) matmul per kh tap.
    """
    _, _, Ci, Co = w_hwio.shape
    T = jnp.zeros((3, (W + 2) * Ci, W * Co), w_hwio.dtype)
    for kw in range(3):
        for w in range(W):
            T = T.at[:, (w + kw) * Ci:(w + kw + 1) * Ci,
                     w * Co:(w + 1) * Co].set(w_hwio[:, kw])
    return T


def _zero_halo(p_ref, C, H, W):
    """Zero only the 1-pixel halo (4 edge strips) of a (N, H+2, (W+2)*C) scratch."""
    N, Hp, WpC = p_ref.shape
    zrow = jnp.zeros((N, 1, WpC), p_ref.dtype)
    p_ref[:, 0:1, :] = zrow                       # top padded row
    p_ref[:, H + 1:H + 2, :] = zrow               # bottom padded row
    zcol = jnp.zeros((N, Hp, C), p_ref.dtype)
    p_ref[:, :, 0:C] = zcol                       # left padded pixel column
    p_ref[:, :, (W + 1) * C:(W + 2) * C] = zcol   # right padded pixel column


def _make_segblock_kernel(N, H, W, Cin, Cmid, Cout):
    """Builds the fused Conv2dReLU -> Conv2dReLU kernel for static shapes."""

    def conv3x3_bn_relu(p_ref, t_ref, sb_ref):
        """One Conv2dReLU layer from a zero-haloed lane-dense VMEM scratch.

        p_ref : (N, H+2, (W+2)*C)   zero-haloed activation slab
        t_ref : (3, (W+2)*C, W*Co)  block-Toeplitz weights (one per kh tap)
        sb_ref: (2, W*Co)           folded BN [scale; bias], pre-tiled to lanes
        returns (N*H, W*Co) float32 post-ReLU activation slab
        """
        WCo = t_ref.shape[-1]
        acc = jnp.zeros((N * H, WCo), jnp.float32)
        for kh in range(3):
            # Sublane concat over batch (tile-aligned for H % 8 == 0, so ~free).
            rows = jnp.concatenate(
                [p_ref[n, kh:kh + H, :] for n in range(N)], axis=0)
            acc = acc + jnp.dot(rows, t_ref[kh],
                                preferred_element_type=jnp.float32)
        y = acc * sb_ref[0:1, :] + sb_ref[1:2, :]        # folded BN (f32)
        return jnp.maximum(y, 0.0)

    def kernel(x_ref, t1_ref, sb1_ref, t2_ref, sb2_ref, o_ref, p1_ref, p2_ref):
        # Layer 1: build the 1-pixel zero halo in VMEM; interior gets the input slab.
        _zero_halo(p1_ref, Cin, H, W)
        p1_ref[:, 1:H + 1, Cin:(W + 1) * Cin] = x_ref[...]
        y1 = conv3x3_bn_relu(p1_ref, t1_ref, sb1_ref)        # (N*H, W*Cmid)

        # Layer 2: the intermediate activation never leaves VMEM (fused).
        _zero_halo(p2_ref, Cmid, H, W)
        # (N*H, W*Cmid) -> (N, H, W*Cmid): leading-dim split only (layout preserving).
        p2_ref[:, 1:H + 1, Cmid:(W + 1) * Cmid] = y1.reshape(N, H, W * Cmid)
        y2 = conv3x3_bn_relu(p2_ref, t2_ref, sb2_ref)        # (N*H, W*Cout)

        # Lane-dense output store: (N*H, W*Cout) = (32, 128) -> unmasked stores.
        o_ref[...] = y2.astype(o_ref.dtype)

    return kernel


@jax.jit
def segmentation_block(x_nchw, params1, params2):
    """SegmentationBlock.forward: Conv2dReLU -> Conv2dReLU (single pallas_call)."""
    w1, s1, b1 = params1                 # w: HWIO (3, 3, Cin,  Cmid)
    w2, s2, b2 = params2                 # w: HWIO (3, 3, Cmid, Cout)
    N, Cin, H, W = x_nchw.shape
    Cmid = w1.shape[-1]
    Cout = w2.shape[-1]

    # TODO(synk): keep the surrounding model NHWC end-to-end to drop these two
    # full-HBM-pass transposes around a memory-bound kernel.
    x = jnp.transpose(x_nchw, (0, 2, 3, 1))              # NCHW -> NHWC
    x_slab = x.reshape(N, H, W * Cin)                    # free metadata reshape

    # kw shifts folded into block-Toeplitz weight matrices (built once, wrapper-side).
    t1 = _toeplitz_conv_weight(w1, W)                    # (3, (W+2)*Cin,  W*Cmid)
    t2 = _toeplitz_conv_weight(w2, W)                    # (3, (W+2)*Cmid, W*Cout)
    # Folded BN scale/bias, tiled to the lane layout and packed into one operand each.
    sb1 = jnp.stack([jnp.tile(s1, W), jnp.tile(b1, W)])  # (2, W*Cmid)
    sb2 = jnp.stack([jnp.tile(s2, W), jnp.tile(b2, W)])  # (2, W*Cout)

    vmem = pl.BlockSpec(memory_space=pltpu.MemorySpace.VMEM)
    out_slab = pl.pallas_call(
        _make_segblock_kernel(N, H, W, Cin, Cmid, Cout),
        out_shape=jax.ShapeDtypeStruct((N * H, W * Cout), x.dtype),
        in_specs=[vmem, vmem, vmem, vmem, vmem],
        out_specs=vmem,
        scratch_shapes=[
            pltpu.VMEM((N, H + 2, (W + 2) * Cin), jnp.float32),
            pltpu.VMEM((N, H + 2, (W + 2) * Cmid), jnp.float32),
        ],
    )(x_slab, t1, sb1, t2, sb2)

    out = out_slab.reshape(N, H, W, Cout)                # free metadata reshape
    return jnp.transpose(out, (0, 3, 1, 2))              # NHWC -> NCHW


def make_conv2d_relu_params(key, in_channels, out_channels):
    """Deterministic parameters for one Conv2dReLU (use_batchnorm=True, eval mode)."""
    k_w, k_g, k_b = jax.random.split(key, 3)
    # PyTorch conv weight is (Cout, Cin, 3, 3); store HWIO for the kernel.
    w_oihw = 0.1 * jax.random.normal(k_w, (out_channels, in_channels, 3, 3),
                                     jnp.float32)
    w_hwio = jnp.transpose(w_oihw, (2, 3, 1, 0))
    gamma = 1.0 + 0.1 * jax.random.normal(k_g, (out_channels,), jnp.float32)
    beta = 0.1 * jax.random.normal(k_b, (out_channels,), jnp.float32)
    running_mean = jnp.zeros((out_channels,), jnp.float32)
    running_var = jnp.ones((out_channels,), jnp.float32)
    scale = gamma / jnp.sqrt(running_var + BN_EPS)
    bias = beta - running_mean * scale
    return w_hwio, scale, bias


def _reference(x_nchw, params1, params2):
    """Pure-JAX reference (lax conv) for validation."""
    def layer(x, w_hwio, scale, bias):
        y = jax.lax.conv_general_dilated(
            x, w_hwio, window_strides=(1, 1), padding="SAME",
            dimension_numbers=("NHWC", "HWIO", "NHWC"))
        return jnp.maximum(y * scale + bias, 0.0)
    x = jnp.transpose(x_nchw, (0, 2, 3, 1))
    x = layer(x, *params1)
    x = layer(x, *params2)
    return jnp.transpose(x, (0, 3, 1, 2))


if __name__ == "__main__":
    key = jax.random.PRNGKey(0)
    k_x, k_p1, k_p2 = jax.random.split(key, 3)

    in_channels, out_channels = 4, 8
    x = jax.random.normal(k_x, (2, in_channels, 16, 16), jnp.float32)

    params1 = make_conv2d_relu_params(k_p1, in_channels, out_channels)
    params2 = make_conv2d_relu_params(k_p2, out_channels, out_channels)

    out = segmentation_block(x, params1, params2)
    out = jax.block_until_ready(out)

    ref = jax.block_until_ready(_reference(x, params1, params2))
    assert out.shape == (2, out_channels, 16, 16)
    assert jnp.allclose(out, ref, rtol=1e-4, atol=1e-4)

    print("KERNEL_OK")
</pallas_src>

<mosaic_0001>
module attributes {stable_mosaic.version = 11 : i64} {
  func.func @kernel(%arg0: memref<2x16x64xf32, #tpu.memory_space<vmem>>, %arg1: memref<3x72x128xf32, #tpu.memory_space<vmem>>, %arg2: memref<2x128xf32, #tpu.memory_space<vmem>>, %arg3: memref<3x144x128xf32, #tpu.memory_space<vmem>>, %arg4: memref<2x128xf32, #tpu.memory_space<vmem>>, %arg5: memref<32x128xf32, #tpu.memory_space<vmem>>, %arg6: memref<2x18x72xf32, #tpu.memory_space<vmem>>, %arg7: memref<2x18x144xf32, #tpu.memory_space<vmem>>) attributes {dimension_semantics = [], scalar_prefetch = 0 : i64, scratch_operands = 2 : i64, tpu.core_type = #tpu.core_type<tc>} {
    %cst = arith.constant 0.000000e+00 : f32
    %0 = vector.broadcast %cst : f32 to vector<2x1x72xf32>
    %c0 = arith.constant 0 : index
    %c0_0 = arith.constant 0 : index
    %c0_1 = arith.constant 0 : index
    %1 = vector.load %arg6[%c0, %c0_0, %c0_1] : memref<2x18x72xf32, #tpu.memory_space<vmem>>, vector<2x1x72xf32>
    tpu.vector_store %arg6[%c0, %c0_0, %c0_1], %0 {strides = array<i32>} : memref<2x18x72xf32, #tpu.memory_space<vmem>>, vector<2x1x72xf32>,
    %c0_2 = arith.constant 0 : index
    %c17 = arith.constant 17 : index
    %c0_3 = arith.constant 0 : index
    %2 = vector.load %arg6[%c0_2, %c17, %c0_3] : memref<2x18x72xf32, #tpu.memory_space<vmem>>, vector<2x1x72xf32>
    tpu.vector_store %arg6[%c0_2, %c17, %c0_3], %0 {strides = array<i32>} : memref<2x18x72xf32, #tpu.memory_space<vmem>>, vector<2x1x72xf32>,
    %cst_4 = arith.constant 0.000000e+00 : f32
    %3 = vector.broadcast %cst_4 : f32 to vector<2x18x4xf32>
    %c0_5 = arith.constant 0 : index
    %c0_6 = arith.constant 0 : index
    %c0_7 = arith.constant 0 : index
    %4 = vector.load %arg6[%c0_5, %c0_6, %c0_7] : memref<2x18x72xf32, #tpu.memory_space<vmem>>, vector<2x18x4xf32>
    tpu.vector_store %arg6[%c0_5, %c0_6, %c0_7], %3 {strides = array<i32>} : memref<2x18x72xf32, #tpu.memory_space<vmem>>, vector<2x18x4xf32>,
    %c0_8 = arith.constant 0 : index
    %c0_9 = arith.constant 0 : index
    %c68 = arith.constant 68 : index
    %5 = vector.load %arg6[%c0_8, %c0_9, %c68] : memref<2x18x72xf32, #tpu.memory_space<vmem>>, vector<2x18x4xf32>
    tpu.vector_store %arg6[%c0_8, %c0_9, %c68], %3 {strides = array<i32>} : memref<2x18x72xf32, #tpu.memory_space<vmem>>, vector<2x18x4xf32>,
    %c0_10 = arith.constant 0 : index
    %c0_11 = arith.constant 0 : index
    %c0_12 = arith.constant 0 : index
    %6 = vector.load %arg0[%c0_10, %c0_11, %c0_12] : memref<2x16x64xf32, #tpu.memory_space<vmem>>, vector<2x16x64xf32>
    %c0_13 = arith.constant 0 : index
    %c1 = arith.constant 1 : index
    %c4 = arith.constant 4 : index
    %7 = vector.load %arg6[%c0_13, %c1, %c4] : memref<2x18x72xf32, #tpu.memory_space<vmem>>, vector<2x16x64xf32>
    tpu.vector_store %arg6[%c0_13, %c1, %c4], %6 {strides = array<i32>} : memref<2x18x72xf32, #tpu.memory_space<vmem>>, vector<2x16x64xf32>,
    %cst_14 = arith.constant 0.000000e+00 : f32
    %8 = vector.broadcast %cst_14 : f32 to vector<32x128xf32>
    %c0_15 = arith.constant 0 : index
    %c0_16 = arith.constant 0 : index
    %c0_17 = arith.constant 0 : index
    %9 = vector.load %arg6[%c0_15, %c0_16, %c0_17] : memref<2x18x72xf32, #tpu.memory_space<vmem>>, vector<1x16x72xf32>
    %10 = vector.shape_cast %9 : vector<1x16x72xf32> to vector<16x72xf32>
    %c1_18 = arith.constant 1 : index
    %c0_19 = arith.constant 0 : index
    %c0_20 = arith.constant 0 : index
    %11 = vector.load %arg6[%c1_18, %c0_19, %c0_20] : memref<2x18x72xf32, #tpu.memory_space<vmem>>, vector<1x16x72xf32>
    %12 = vector.shape_cast %11 : vector<1x16x72xf32> to vector<16x72xf32>
    %13 = tpu.concatenate %10, %12 in 0 : vector<16x72xf32>, vector<16x72xf32> -> vector<32x72xf32>
    %c0_21 = arith.constant 0 : index
    %c0_22 = arith.constant 0 : index
    %c0_23 = arith.constant 0 : index
    %14 = vector.load %arg1[%c0_21, %c0_22, %c0_23] : memref<3x72x128xf32, #tpu.memory_space<vmem>>, vector<1x72x128xf32>
    %15 = vector.shape_cast %14 : vector<1x72x128xf32> to vector<72x128xf32>
    %cst_24 = arith.constant dense<0.000000e+00> : vector<32x128xf32>
    %16 = tpu.matmul %13, %15, %cst_24 {dimension_numbers = #tpu.dot_dimension_numbers<[1], [0], [0], [1], [0, 0, 1, 1], [], []>} : vector<32x72xf32>, vector<72x128xf32>, vector<32x128xf32> -> vector<32x128xf32>
    %17 = arith.addf %8, %16 : vector<32x128xf32>
    %c0_25 = arith.constant 0 : index
    %c1_26 = arith.constant 1 : index
    %c0_27 = arith.constant 0 : index
    %18 = vector.load %arg6[%c0_25, %c1_26, %c0_27] : memref<2x18x72xf32, #tpu.memory_space<vmem>>, vector<1x16x72xf32>
    %19 = vector.shape_cast %18 : vector<1x16x72xf32> to vector<16x72xf32>
    %c1_28 = arith.constant 1 : index
    %c1_29 = arith.constant 1 : index
    %c0_30 = arith.constant 0 : index
    %20 = vector.load %arg6[%c1_28, %c1_29, %c0_30] : memref<2x18x72xf32, #tpu.memory_space<vmem>>, vector<1x16x72xf32>
    %21 = vector.shape_cast %20 : vector<1x16x72xf32> to vector<16x72xf32>
    %22 = tpu.concatenate %19, %21 in 0 : vector<16x72xf32>, vector<16x72xf32> -> vector<32x72xf32>
    %c1_31 = arith.constant 1 : index
    %c0_32 = arith.constant 0 : index
    %c0_33 = arith.constant 0 : index
    %23 = vector.load %arg1[%c1_31, %c0_32, %c0_33] : memref<3x72x128xf32, #tpu.memory_space<vmem>>, vector<1x72x128xf32>
    %24 = vector.shape_cast %23 : vector<1x72x128xf32> to vector<72x128xf32>
    %cst_34 = arith.constant dense<0.000000e+00> : vector<32x128xf32>
    %25 = tpu.matmul %22, %24, %cst_34 {dimension_numbers = #tpu.dot_dimension_numbers<[1], [0], [0], [1], [0, 0, 1, 1], [], []>} : vector<32x72xf32>, vector<72x128xf32>, vector<32x128xf32> -> vector<32x128xf32>
    %26 = arith.addf %17, %25 : vector<32x128xf32>
    %c0_35 = arith.constant 0 : index
    %c2 = arith.constant 2 : index
    %c0_36 = arith.constant 0 : index
    %27 = vector.load %arg6[%c0_35, %c2, %c0_36] : memref<2x18x72xf32, #tpu.memory_space<vmem>>, vector<1x16x72xf32>
    %28 = vector.shape_cast %27 : vector<1x16x72xf32> to vector<16x72xf32>
    %c1_37 = arith.constant 1 : index
    %c2_38 = arith.constant 2 : index
    %c0_39 = arith.constant 0 : index
    %29 = vector.load %arg6[%c1_37, %c2_38, %c0_39] : memref<2x18x72xf32, #tpu.memory_space<vmem>>, vector<1x16x72xf32>
    %30 = vector.shape_cast %29 : vector<1x16x72xf32> to vector<16x72xf32>
    %31 = tpu.concatenate %28, %30 in 0 : vector<16x72xf32>, vector<16x72xf32> -> vector<32x72xf32>
    %c2_40 = arith.constant 2 : index
    %c0_41 = arith.constant 0 : index
    %c0_42 = arith.constant 0 : index
    %32 = vector.load %arg1[%c2_40, %c0_41, %c0_42] : memref<3x72x128xf32, #tpu.memory_space<vmem>>, vector<1x72x128xf32>
    %33 = vector.shape_cast %32 : vector<1x72x128xf32> to vector<72x128xf32>
    %cst_43 = arith.constant dense<0.000000e+00> : vector<32x128xf32>
    %34 = tpu.matmul %31, %33, %cst_43 {dimension_numbers = #tpu.dot_dimension_numbers<[1], [0], [0], [1], [0, 0, 1, 1], [], []>} : vector<32x72xf32>, vector<72x128xf32>, vector<32x128xf32> -> vector<32x128xf32>
    %35 = arith.addf %26, %34 : vector<32x128xf32>
    %c0_44 = arith.constant 0 : index
    %c0_45 = arith.constant 0 : index
    %36 = vector.load %arg2[%c0_44, %c0_45] : memref<2x128xf32, #tpu.memory_space<vmem>>, vector<1x128xf32>
    %37 = vector.broadcast %36 : vector<1x128xf32> to vector<32x128xf32>
    %38 = arith.mulf %35, %37 : vector<32x128xf32>
    %c1_46 = arith.constant 1 : index
    %c0_47 = arith.constant 0 : index
    %39 = vector.load %arg2[%c1_46, %c0_47] : memref<2x128xf32, #tpu.memory_space<vmem>>, vector<1x128xf32>
    %40 = vector.broadcast %39 : vector<1x128xf32> to vector<32x128xf32>
    %41 = arith.addf %38, %40 : vector<32x128xf32>
    %cst_48 = arith.constant 0.000000e+00 : f32
    %42 = vector.broadcast %cst_48 : f32 to vector<32x128xf32>
    %43 = arith.maximumf %41, %42 : vector<32x128xf32>
    %cst_49 = arith.constant 0.000000e+00 : f32
    %44 = vector.broadcast %cst_49 : f32 to vector<2x1x144xf32>
    %c0_50 = arith.constant 0 : index
    %c0_51 = arith.constant 0 : index
    %c0_52 = arith.constant 0 : index
    %45 = vector.load %arg7[%c0_50, %c0_51, %c0_52] : memref<2x18x144xf32, #tpu.memory_space<vmem>>, vector<2x1x144xf32>
    tpu.vector_store %arg7[%c0_50, %c0_51, %c0_52], %44 {strides = array<i32>} : memref<2x18x144xf32, #tpu.memory_space<vmem>>, vector<2x1x144xf32>,
    %c0_53 = arith.constant 0 : index
    %c17_54 = arith.constant 17 : index
    %c0_55 = arith.constant 0 : index
    %46 = vector.load %arg7[%c0_53, %c17_54, %c0_55] : memref<2x18x144xf32, #tpu.memory_space<vmem>>, vector<2x1x144xf32>
    tpu.vector_store %arg7[%c0_53, %c17_54, %c0_55], %44 {strides = array<i32>} : memref<2x18x144xf32, #tpu.memory_space<vmem>>, vector<2x1x144xf32>,
    %cst_56 = arith.constant 0.000000e+00 : f32
    %47 = vector.broadcast %cst_56 : f32 to vector<2x18x8xf32>
    %c0_57 = arith.constant 0 : index
    %c0_58 = arith.constant 0 : index
    %c0_59 = arith.constant 0 : index
    %48 = vector.load %arg7[%c0_57, %c0_58, %c0_59] : memref<2x18x144xf32, #tpu.memory_space<vmem>>, vector<2x18x8xf32>
    tpu.vector_store %arg7[%c0_57, %c0_58, %c0_59], %47 {strides = array<i32>} : memref<2x18x144xf32, #tpu.memory_space<vmem>>, vector<2x18x8xf32>,
    %c0_60 = arith.constant 0 : index
    %c0_61 = arith.constant 0 : index
    %c136 = arith.constant 136 : index
    %49 = vector.load %arg7[%c0_60, %c0_61, %c136] : memref<2x18x144xf32, #tpu.memory_space<vmem>>, vector<2x18x8xf32>
    tpu.vector_store %arg7[%c0_60, %c0_61, %c136], %47 {strides = array<i32>} : memref<2x18x144xf32, #tpu.memory_space<vmem>>, vector<2x18x8xf32>,
    %50 = vector.shape_cast %43 : vector<32x128xf32> to vector<2x16x128xf32>
    %c0_62 = arith.constant 0 : index
    %c1_63 = arith.constant 1 : index
    %c8 = arith.constant 8 : index
    %51 = vector.load %arg7[%c0_62, %c1_63, %c8] : memref<2x18x144xf32, #tpu.memory_space<vmem>>, vector<2x16x128xf32>
    tpu.vector_store %arg7[%c0_62, %c1_63, %c8], %50 {strides = array<i32>} : memref<2x18x144xf32, #tpu.memory_space<vmem>>, vector<2x16x128xf32>,
    %cst_64 = arith.constant 0.000000e+00 : f32
    %52 = vector.broadcast %cst_64 : f32 to vector<32x128xf32>
    %c0_65 = arith.constant 0 : index
    %c0_66 = arith.constant 0 : index
    %c0_67 = arith.constant 0 : index
    %53 = vector.load %arg7[%c0_65, %c0_66, %c0_67] : memref<2x18x144xf32, #tpu.memory_space<vmem>>, vector<1x16x144xf32>
    %54 = vector.shape_cast %53 : vector<1x16x144xf32> to vector<16x144xf32>
    %c1_68 = arith.constant 1 : index
    %c0_69 = arith.constant 0 : index
    %c0_70 = arith.constant 0 : index
    %55 = vector.load %arg7[%c1_68, %c0_69, %c0_70] : memref<2x18x144xf32, #tpu.memory_space<vmem>>, vector<1x16x144xf32>
    %56 = vector.shape_cast %55 : vector<1x16x144xf32> to vector<16x144xf32>
    %57 = tpu.concatenate %54, %56 in 0 : vector<16x144xf32>, vector<16x144xf32> -> vector<32x144xf32>
    %c0_71 = arith.constant 0 : index
    %c0_72 = arith.constant 0 : index
    %c0_73 = arith.constant 0 : index
    %58 = vector.load %arg3[%c0_71, %c0_72, %c0_73] : memref<3x144x128xf32, #tpu.memory_space<vmem>>, vector<1x144x128xf32>
    %59 = vector.shape_cast %58 : vector<1x144x128xf32> to vector<144x128xf32>
    %cst_74 = arith.constant dense<0.000000e+00> : vector<32x128xf32>
    %60 = tpu.matmul %57, %59, %cst_74 {dimension_numbers = #tpu.dot_dimension_numbers<[1], [0], [0], [1], [0, 0, 1, 1], [], []>} : vector<32x144xf32>, vector<144x128xf32>, vector<32x128xf32> -> vector<32x128xf32>
    %61 = arith.addf %52, %60 : vector<32x128xf32>
    %c0_75 = arith.constant 0 : index
    %c1_76 = arith.constant 1 : index
    %c0_77 = arith.constant 0 : index
    %62 = vector.load %arg7[%c0_75, %c1_76, %c0_77] : memref<2x18x144xf32, #tpu.memory_space<vmem>>, vector<1x16x144xf32>
    %63 = vector.shape_cast %62 : vector<1x16x144xf32> to vector<16x144xf32>
    %c1_78 = arith.constant 1 : index
    %c1_79 = arith.constant 1 : index
    %c0_80 = arith.constant 0 : index
    %64 = vector.load %arg7[%c1_78, %c1_79, %c0_80] : memref<2x18x144xf32, #tpu.memory_space<vmem>>, vector<1x16x144xf32>
    %65 = vector.shape_cast %64 : vector<1x16x144xf32> to vector<16x144xf32>
    %66 = tpu.concatenate %63, %65 in 0 : vector<16x144xf32>, vector<16x144xf32> -> vector<32x144xf32>
    %c1_81 = arith.constant 1 : index
    %c0_82 = arith.constant 0 : index
    %c0_83 = arith.constant 0 : index
    %67 = vector.load %arg3[%c1_81, %c0_82, %c0_83] : memref<3x144x128xf32, #tpu.memory_space<vmem>>, vector<1x144x128xf32>
    %68 = vector.shape_cast %67 : vector<1x144x128xf32> to vector<144x128xf32>
    %cst_84 = arith.constant dense<0.000000e+00> : vector<32x128xf32>
    %69 = tpu.matmul %66, %68, %cst_84 {dimension_numbers = #tpu.dot_dimension_numbers<[1], [0], [0], [1], [0, 0, 1, 1], [], []>} : vector<32x144xf32>, vector<144x128xf32>, vector<32x128xf32> -> vector<32x128xf32>
    %70 = arith.addf %61, %69 : vector<32x128xf32>
    %c0_85 = arith.constant 0 : index
    %c2_86 = arith.constant 2 : index
    %c0_87 = arith.constant 0 : index
    %71 = vector.load %arg7[%c0_85, %c2_86, %c0_87] : memref<2x18x144xf32, #tpu.memory_space<vmem>>, vector<1x16x144xf32>
    %72 = vector.shape_cast %71 : vector<1x16x144xf32> to vector<16x144xf32>
    %c1_88 = arith.constant 1 : index
    %c2_89 = arith.constant 2 : index
    %c0_90 = arith.constant 0 : index
    %73 = vector.load %arg7[%c1_88, %c2_89, %c0_90] : memref<2x18x144xf32, #tpu.memory_space<vmem>>, vector<1x16x144xf32>
    %74 = vector.shape_cast %73 : vector<1x16x144xf32> to vector<16x144xf32>
    %75 = tpu.concatenate %72, %74 in 0 : vector<16x144xf32>, vector<16x144xf32> -> vector<32x144xf32>
    %c2_91 = arith.constant 2 : index
    %c0_92 = arith.constant 0 : index
    %c0_93 = arith.constant 0 : index
    %76 = vector.load %arg3[%c2_91, %c0_92, %c0_93] : memref<3x144x128xf32, #tpu.memory_space<vmem>>, vector<1x144x128xf32>
    %77 = vector.shape_cast %76 : vector<1x144x128xf32> to vector<144x128xf32>
    %cst_94 = arith.constant dense<0.000000e+00> : vector<32x128xf32>
    %78 = tpu.matmul %75, %77, %cst_94 {dimension_numbers = #tpu.dot_dimension_numbers<[1], [0], [0], [1], [0, 0, 1, 1], [], []>} : vector<32x144xf32>, vector<144x128xf32>, vector<32x128xf32> -> vector<32x128xf32>
    %79 = arith.addf %70, %78 : vector<32x128xf32>
    %c0_95 = arith.constant 0 : index
    %c0_96 = arith.constant 0 : index
    %80 = vector.load %arg4[%c0_95, %c0_96] : memref<2x128xf32, #tpu.memory_space<vmem>>, vector<1x128xf32>
    %81 = vector.broadcast %80 : vector<1x128xf32> to vector<32x128xf32>
    %82 = arith.mulf %79, %81 : vector<32x128xf32>
    %c1_97 = arith.constant 1 : index
    %c0_98 = arith.constant 0 : index
    %83 = vector.load %arg4[%c1_97, %c0_98] : memref<2x128xf32, #tpu.memory_space<vmem>>, vector<1x128xf32>
    %84 = vector.broadcast %83 : vector<1x128xf32> to vector<32x128xf32>
    %85 = arith.addf %82, %84 : vector<32x128xf32>
    %cst_99 = arith.constant 0.000000e+00 : f32
    %86 = vector.broadcast %cst_99 : f32 to vector<32x128xf32>
    %87 = arith.maximumf %85, %86 : vector<32x128xf32>
    %c0_100 = arith.constant 0 : index
    %c0_101 = arith.constant 0 : index
    %88 = vector.load %arg5[%c0_100, %c0_101] : memref<32x128xf32, #tpu.memory_space<vmem>>, vector<32x128xf32>
    tpu.vector_store %arg5[%c0_100, %c0_101], %87 {strides = array<i32>} : memref<32x128xf32, #tpu.memory_space<vmem>>, vector<32x128xf32>,
    return
  }
}

</mosaic_0001>

<bundles_post_ra>
// kernel: tile.23
= control target key start
LH: loop header
LB: loop body
LE: loop exit
PB: predicated region body
PF: predicated region fallthrough
CT: control target
= control target key end

     0   :  { %s28_s0 = inlined_call_operand.vmem [shape: f32[8], index: 0, kind: input, shape index: {}]   ;;  %s29_s1 = inlined_call_operand.vmem [shape: f32[16,8], index: 1, kind: output, shape index: {}]  }
   0x1   :  { %v4_v0 = vld [vmem:[%s28_s0] ss:$0 sm:$0xff] }
   0x2   :  { %5 = vst [vmem:[%s29_s1] sm:$0xff] %v4_v0 }
   0x3   :  { %8 = vst [vmem:[%s29_s1 + $0x8] sm:$0xff] %v4_v0 }

// kernel: tile.28
= control target key start
LH: loop header
LB: loop body
LE: loop exit
PB: predicated region body
PF: predicated region fallthrough
CT: control target
= control target key end

     0   :  { %s131_s10 = smov 120   ;;  %s132_s11 = smov 104   ;;  %vm3_vm0 = vcmask 64512   ;;  %vm9_vm1 = vcmask 1048512   ;;  %vm15_vm2 = vcmask 982912   ;;  %vm21_vm3 = vcmask 917312   ;;  %s207_s0 = inlined_call_operand.vmem [shape: f32[16,8], index: 0, kind: input, shape index: {}]   ;;  %s208_s1 = inlined_call_operand.vmem [shape: f32[1,128], index: 1, kind: output, shape index: {}]  }
   0x1   :  { %v101_v0 = vld [vmem:[%s207_s0 + $0xf] sm:$0x1]   ;;  %v103_v1 = vld [vmem:[%s207_s0 + $0xd] sm:$0x1]   ;;  %v105_v2 = vld [vmem:[%s207_s0 + $0xb] sm:$0x1]  }
   0x2   :  { %7 = vrot.lane.b32.xlu0 %v101_v0, %s131_s10  ;;  %19 = vrot.lane.b32.xlu1 %v103_v1, %s132_s11  ;;  %s133_s14 = smov 88   ;;  %v102_v3 = vld [vmem:[%s207_s0 + $0xe] sm:$0x1]   ;;  %v104_v4 = vld [vmem:[%s207_s0 + $0xc] sm:$0x1]   ;;  %s134_s19 = smov 112  }
   0x3   :  { %31 = vrot.lane.b32.xlu2 %v105_v2, %s133_s14  ;;  %s135_s20 = smov 96   ;;  %v106_v5 = vld [vmem:[%s207_s0 + $0xa] sm:$0x1]   ;;  %s136_s23 = smov 80   ;;  %v107_v6 = vld [vmem:[%s207_s0 + $0x9] sm:$0x1]  }
   0x4   :  { %v108_v7 = vld [vmem:[%s207_s0 + $0x8] sm:$0x1]   ;;  %s137_s28 = smov 72   ;;  %s138_s29 = smov 64   ;;  %v109_v8 = vld [vmem:[%s207_s0 + $0x7] sm:$0x1]  }
   0x5   :  { %s139_s3 = smov 56   ;;  %v110_v9 = vld [vmem:[%s207_s0 + $0x6] sm:$0x1]   ;;  %v111_v10 = vld [vmem:[%s207_s0 + $0x5] sm:$0x1]   ;;  %s140_s8 = smov 48  }
   0x6   :  { %s141_s9 = smov 40   ;;  %v112_v11 = vld [vmem:[%s207_s0 + $0x4] sm:$0x1]   ;;  %s142_s12 = smov 32   ;;  %v113_v12 = vld [vmem:[%s207_s0 + $0x3] sm:$0x1]  }
   0x7   :  { %v114_v13 = vld [vmem:[%s207_s0 + $0x2] sm:$0x1]   ;;  %s143_s17 = smov 24   ;;  %s144_s18 = smov 16   ;;  %v115_v14 = vld [vmem:[%s207_s0 + $0x1] sm:$0x1]  }
   0x8   :  { %s145_s21 = smov 8   ;;  %v2_v15 = vld [vmem:[%s207_s0] sm:$0x1]   ;;  %vm27_vm4 = vcmask 851712   ;;  %vm33_vm5 = vcmask 786112   ;;  %vm39_vm6 = vcmask 720512  }
   0x9   :  { %4 = vst.msk [vmem:[#allocation0] sm:$0x1] %vm3_vm0, %v2_v15   ;;  %vm45_vm7 = vcmask 654912   ;;  %vm51_vm8 = vcmask 589312   ;;  %vm57_vm9 = vcmask 523712   ;;  %vm63_vm10 = vcmask 458112  }
   0xa   :  { %13 = vrot.lane.b32.xlu0 %v102_v3, %s134_s19  ;;  %25 = vrot.lane.b32.xlu1 %v104_v4, %s135_s20  ;;  %vm69_vm11 = vcmask 392512   ;;  %vm75_vm12 = vcmask 326912   ;;  %vm81_vm13 = vcmask 261312   ;;  %vm87_vm14 = vcmask 195712  }
   0xb   :  { %37 = vrot.lane.b32.xlu2 %v106_v5, %s136_s23  ;;  %vm93_vm15 = vcmask 130112  }
  0x12   :  { %43 = vrot.lane.b32.xlu0 %v107_v6, %s137_s28  ;;  %49 = vrot.lane.b32.xlu1 %v108_v7, %s138_s29 }
  0x13   :  { %55 = vrot.lane.b32.xlu2 %v109_v8, %s139_s3 }
  0x1a   :  { %61 = vrot.lane.b32.xlu0 %v110_v9, %s140_s8  ;;  %67 = vrot.lane.b32.xlu1 %v111_v10, %s141_s9 }
  0x1b   :  { %73 = vrot.lane.b32.xlu2 %v112_v11, %s142_s12 }
  0x22   :  { %79 = vrot.lane.b32.xlu0 %v113_v12, %s143_s17  ;;  %85 = vrot.lane.b32.xlu1 %v114_v13, %s144_s18 }
  0x23   :  { %91 = vrot.lane.b32.xlu2 %v115_v14, %s145_s21 }
  0x5d   :  { %v32_v16 = vpop.permute.xlu2 %31  }
  0x65   :  { %v38_v17 = vpop.permute.xlu2 %37  }
  0x6d   :  { %v56_v18 = vpop.permute.xlu2 %55  }
  0x74   :  { %v8_v19 = vpop.permute.xlu0 %7   ;;  %v20_v20 = vpop.permute.xlu1 %19  }
  0x75   :  { %10 = vst.msk [vmem:[#allocation0] sm:$0x1] %vm9_vm1, %v8_v19   ;;  %v74_v21 = vpop.permute.xlu2 %73  }
  0x7c   :  { %v14_v22 = vpop.permute.xlu0 %13   ;;  %v26_v23 = vpop.permute.xlu1 %25  }
  0x7d   :  { %16 = vst.msk [vmem:[#allocation0] sm:$0x1] %vm15_vm2, %v14_v22   ;;  %v92_v24 = vpop.permute.xlu2 %91  }
  0x7e   :  { %22 = vst.msk [vmem:[#allocation0] sm:$0x1] %vm21_vm3, %v20_v20  }
  0x7f   :  { %28 = vst.msk [vmem:[#allocation0] sm:$0x1] %vm27_vm4, %v26_v23  }
  0x80   :  { %34 = vst.msk [vmem:[#allocation0] sm:$0x1] %vm33_vm5, %v32_v16  }
  0x81   :  { %40 = vst.msk [vmem:[#allocation0] sm:$0x1] %vm39_vm6, %v38_v17  }
  0x84   :  { %v44_v25 = vpop.permute.xlu0 %43   ;;  %v50_v26 = vpop.permute.xlu1 %49  }
  0x85   :  { %46 = vst.msk [vmem:[#allocation0] sm:$0x1] %vm45_vm7, %v44_v25  }
  0x86   :  { %52 = vst.msk [vmem:[#allocation0] sm:$0x1] %vm51_vm8, %v50_v26  }
  0x87   :  { %58 = vst.msk [vmem:[#allocation0] sm:$0x1] %vm57_vm9, %v56_v18  }
  0x8c   :  { %v62_v27 = vpop.permute.xlu0 %61   ;;  %v68_v28 = vpop.permute.xlu1 %67  }
  0x8d   :  { %64 = vst.msk [vmem:[#allocation0] sm:$0x1] %vm63_vm10, %v62_v27  }
  0x8e   :  { %70 = vst.msk [vmem:[#allocation0] sm:$0x1] %vm69_vm11, %v68_v28  }
  0x8f   :  { %76 = vst.msk [vmem:[#allocation0] sm:$0x1] %vm75_vm12, %v74_v21  }
  0x94   :  { %v80_v29 = vpop.permute.xlu0 %79   ;;  %v86_v30 = vpop.permute.xlu1 %85  }
  0x95   :  { %82 = vst.msk [vmem:[#allocation0] sm:$0x1] %vm81_vm13, %v80_v29  }
  0x96   :  { %88 = vst.msk [vmem:[#allocation0] sm:$0x1] %vm87_vm14, %v86_v30  }
  0x97   :  { %94 = vst.msk [vmem:[#allocation0] sm:$0x1] %vm93_vm15, %v92_v24  }
  0x9e   :  { %v97_v31 = vld [vmem:[#allocation0] sm:$0x1] }
  0x9f   :  { %100 = vst [vmem:[%s208_s1] sm:$0x1] %v97_v31 }

// kernel: segmentation_block.1
= control target key start
LH: loop header
LB: loop body
LE: loop exit
PB: predicated region body
PF: predicated region fallthrough
CT: control target
= control target key end

     0   :  { %vm20_vm0 = vcmask 581632   ;;  %vm25_vm1 = vcmask 31744   ;;  %v798_v2 = vmov 0.0   ;;  %vm33_vm2 = vcmask 589344   ;;  %s799_s22 = smov 4   ;;  %s1267_s0 = inlined_call_operand.vmem [shape: f32[2,16,64], index: 0, kind: input, shape index: {}]   ;;  %s1268_s1 = inlined_call_operand.vmem [shape: f32[3,72,128], index: 1, kind: input, shape index: {}]   ;;  %s1269_s2 = inlined_call_operand.vmem [shape: f32[2,128], index: 2, kind: input, shape index: {}]   ;;  %s1270_s3 = inlined_call_operand.vmem [shape: f32[3,144,128], index: 3, kind: input, shape index: {}]   ;;  %s1271_s4 = inlined_call_operand.vmem [shape: f32[2,128], index: 4, kind: input, shape index: {}]   ;;  %s1272_s5 = inlined_call_operand.vmem [shape: f32[32,128], index: 5, kind: output, shape index: {}]  }
   0x1   :  { %v41_v0 = vld [vmem:[%s1267_s0] sm:$0xff]  ;;  %v43_v1 = vld [vmem:[%s1267_s0 + $0x10] sm:$0xff]  ;;  %21 = vst.msk [vmem:[#allocation2] sm:$0x1] %vm20_vm0, %v798_v2  ;;  %v717_v3 = vld [vmem:[%s1268_s1 + $0x88] sm:$0xff]  ;;  %vm28_vm3 = vcmask 25600   ;;  %v252_v60 = vlaneseq }
   0x2   :  { %49 = vrot.lane.b32.xlu0 %v41_v0, %s799_s22  ;;  %53 = vrot.lane.b32.xlu1 %v43_v1, %s799_s22  ;;  %26 = vst.msk [vmem:[#allocation2] sm:$0xff] %vm25_vm1, %v798_v2  ;;  %v79_v4 = vld [vmem:[%s1268_s1 + $0x40] sm:$0xff]  ;;  %v78_v6 = vld [vmem:[%s1268_s1 + $0x38] sm:$0xff]  ;;  %vm36_vm4 = vcmask 583200   ;;  %vm61_vm5 = vcmask 556064   ;;  %vm94_vm6 = vcmask 588800  }
   0x3   :  { %114 = vmatpush.msra.mxu0 %v717_v3  ;;  %v716_v5 = vld [vmem:[%s1268_s1 + $0x80] sm:$0xff]  ;;  %27 = vst.msk [vmem:[#allocation2 + $0x8] sm:$0xff] %vm25_vm1, %v798_v2  ;;  %155 = vmatpush.msra.mxu1 %v79_v4  ;;  %v715_v7 = vld [vmem:[%s1268_s1 + $0x78] sm:$0xff]  ;;  %v77_v8 = vld [vmem:[%s1268_s1 + $0x30] sm:$0xff]  ;;  %vm267_vm7 = vcmask 64512   ;;  %vm999_vm8 = vcmp.lt.s32.totalorder %v252_v60, 144 }
   0x4   :  { %34 = vst.msk [vmem:[#allocation2] sm:$0xff] %vm33_vm2, %v798_v2  ;;  %v714_v9 = vld [vmem:[%s1268_s1 + $0x70] sm:$0xff]  ;;  %v42_v11 = vld [vmem:[%s1267_s0 + $0x8] sm:$0xff]  ;;  %v44_v12 = vld [vmem:[%s1267_s0 + $0x18] sm:$0xff]  ;;  %vm275_vm9 = vcmask 130112   ;;  %s800_s0 = smov 8  }
   0x5   :  { %115 = vmatpush.msra.mxu0 %v716_v5  ;;  %35 = vst.msk [vmem:[#allocation2 + $0x8] sm:$0xff] %vm33_vm2, %v798_v2  ;;  %156 = vmatpush.msra.mxu1 %v78_v6  ;;  %v734_v10 = vld [vmem:[%s1268_s1 + $0xd0] sm:$0xff]  ;;  %v76_v13 = vld [vmem:[%s1268_s1 + $0x28] sm:$0xff]  ;;  %v75_v15 = vld [vmem:[%s1268_s1 + $0x20] sm:$0xff]  ;;  %vm287_vm10 = vcmask 1040384   ;;  %vm270_vm11 = vcmask 58368  }
   0x6   :  { %22 = vst.msk [vmem:[#allocation2 + $0x18] sm:$0x1] %vm20_vm0, %v798_v2  ;;  %210 = vmatpush.msra.mxu2 %v734_v10  ;;  %v713_v14 = vld [vmem:[%s1268_s1 + $0x68] sm:$0xff]  ;;  %v712_v16 = vld [vmem:[%s1268_s1 + $0x60] sm:$0xff]  ;;  %v74_v17 = vld [vmem:[%s1268_s1 + $0x18] sm:$0xff]  ;;  %vm278_vm12 = vcmask 123968  }
   0x7   :  { %116 = vmatpush.msra.mxu0 %v715_v7  ;;  %23 = vst.msk [vmem:[#allocation2 + $0x11] sm:$0x1] %vm20_vm0, %v798_v2  ;;  %157 = vmatpush.msra.mxu1 %v77_v8  ;;  %v733_v18 = vld [vmem:[%s1268_s1 + $0xc8] sm:$0xff]  ;;  %v711_v19 = vld [vmem:[%s1268_s1 + $0x58] sm:$0xff]  ;;  %v73_v20 = vld [vmem:[%s1268_s1 + $0x10] sm:$0xff]  ;;  %vm312_vm13 = vcmask 1047617  }
   0x8   :  { %24 = vst.msk [vmem:[#allocation2 + $0x29] sm:$0x1] %vm20_vm0, %v798_v2  ;;  %v732_v21 = vld [vmem:[%s1268_s1 + $0xc0] sm:$0xff]  ;;  %211 = vmatpush.msra.mxu2 %v733_v18  ;;  %v710_v22 = vld [vmem:[%s1268_s1 + $0x50] sm:$0xff]  ;;  %v72_v23 = vld [vmem:[%s1268_s1 + $0x8] sm:$0xff]  ;;  %vm314_vm14 = vcmask 64513  }
   0x9   :  { %117 = vmatpush.msra.mxu0 %v714_v9  ;;  %31 = vst.msk [vmem:[#allocation2 + $0x20] sm:$0xff] %vm25_vm1, %v798_v2  ;;  %158 = vmatpush.msra.mxu1 %v76_v13  ;;  %v731_v24 = vld [vmem:[%s1268_s1 + $0xb8] sm:$0xff]  ;;  %v709_v25 = vld [vmem:[%s1268_s1 + $0x48] sm:$0xff]  ;;  %v71_v26 = vld [vmem:[%s1268_s1] sm:$0xff]  ;;  %vm420_vm15 = vcmask 130048   ;;  %vm316_vm0 = vcmask 1047616  }
   0xa   :  { %51 = vrot.lane.b32.xlu0 %v42_v11, %s799_s22  ;;  %55 = vrot.lane.b32.xlu1 %v44_v12, %s799_s22  ;;  %30 = vst.msk [vmem:[#allocation2 + $0x18] sm:$0xff] %vm25_vm1, %v798_v2  ;;  %v730_v27 = vld [vmem:[%s1268_s1 + $0xb0] sm:$0xff]  ;;  %v729_v28 = vld [vmem:[%s1268_s1 + $0xa8] sm:$0xff]  ;;  %vm370_vm1 = vcmask 1046528  }
   0xb   :  { %118 = vmatpush.msra.mxu0 %v713_v14  ;;  %39 = vst.msk [vmem:[#allocation2 + $0x20] sm:$0xff] %vm33_vm2, %v798_v2  ;;  %159 = vmatpush.msra.mxu1 %v75_v15  ;;  %v728_v29 = vld [vmem:[%s1268_s1 + $0xa0] sm:$0xff]  ;;  %v727_v30 = vld [vmem:[%s1268_s1 + $0x98] sm:$0xff]  ;;  %v726_v31 = vld [vmem:[%s1268_s1 + $0x90] sm:$0xff] }
   0xc   :  { %38 = vst.msk [vmem:[#allocation2 + $0x18] sm:$0xff] %vm33_vm2, %v798_v2  ;;  %212 = vmatpush.msra.mxu2 %v732_v21  ;;  %v973_v52 = vld [vmem:[%s1269_s2] ss:$0 sm:$0xff]  ;;  %v978_v56 = vld [vmem:[%s1269_s2 + $0x1] ss:$0 sm:$0xff]  ;;  %v353_v58 = vld [vmem:[%s1270_s3 + $0x78] sm:$0xff] }
   0xd   :  { %119 = vmatpush.msra.mxu0 %v712_v16  ;;  %160 = vmatpush.msra.mxu1 %v74_v17  ;;  %29 = vst.msk [vmem:[#allocation2 + $0x10] sm:$0x3] %vm28_vm3, %v798_v2  ;;  %v352_v59 = vld [vmem:[%s1270_s3 + $0x70] sm:$0xff]  ;;  %v351_v62 = vld [vmem:[%s1270_s3 + $0x68] sm:$0xff]  ;;  %v753_v0 = vld [vmem:[%s1270_s3 + $0x100] sm:$0xff]  ;;  %vm319_vm2 = vcmask 1040448  }
   0xe   :  { %37 = vst.msk [vmem:[#allocation2 + $0x10] sm:$0x3] %vm36_vm4, %v798_v2  ;;  %213 = vmatpush.msra.mxu2 %v731_v24  ;;  %v754_v63 = vld [vmem:[%s1270_s3 + $0x108] sm:$0xff]  ;;  %v350_v6 = vld [vmem:[%s1270_s3 + $0x60] sm:$0xff]  ;;  %v752_v9 = vld [vmem:[%s1270_s3 + $0xf8] sm:$0xff] }
   0xf   :  { %120 = vmatpush.msra.mxu0 %v711_v19  ;;  %161 = vmatpush.msra.mxu1 %v73_v20  ;;  %32 = vst.msk [vmem:[#allocation2 + $0x28] sm:$0x3] %vm28_vm3, %v798_v2  ;;  %v349_v12 = vld [vmem:[%s1270_s3 + $0x58] sm:$0xff]  ;;  %v751_v14 = vld [vmem:[%s1270_s3 + $0xf0] sm:$0xff]  ;;  %v750_v17 = vld [vmem:[%s1270_s3 + $0xe8] sm:$0xff]  ;;  %vm321_vm3 = vcmask 57344  }
  0x10   :  { %40 = vst.msk [vmem:[#allocation2 + $0x28] sm:$0x3] %vm36_vm4, %v798_v2  ;;  %214 = vmatpush.msra.mxu2 %v730_v27  ;;  %429 = vmatpush.msra.mxu3 %v754_v63  ;;  %v348_v15 = vld [vmem:[%s1270_s3 + $0x50] sm:$0xff]  ;;  %v347_v18 = vld [vmem:[%s1270_s3 + $0x48] sm:$0xff]  ;;  %v749_v21 = vld [vmem:[%s1270_s3 + $0xe0] sm:$0xff]  ;;  %vm567_vm4 = vcmask 1045504  }
  0x11   :  { %121 = vmatpush.msra.mxu0 %v710_v22  ;;  %162 = vmatpush.msra.mxu1 %v72_v23  ;;  %269 = vst.msk [vmem:[#allocation3 + $0x10] sm:$0xff] %vm267_vm7, %v798_v2  ;;  %v346_v23 = vld [vmem:[%s1270_s3 + $0x40] sm:$0xff]  ;;  %v740_v60 = vld [vmem:[%s1270_s3 + $0x98] sm:$0xff]  ;;  %v779_v1 = vld [vmem:[%s1270_s3 + $0x190] sm:$0xff] }
  0x12   :  { %215 = vmatpush.msra.mxu2 %v729_v28  ;;  %273 = vst.msk [vmem:[#allocation3 + $0x40] sm:$0xff] %vm267_vm7, %v798_v2  ;;  %430 = vmatpush.msra.mxu3 %v753_v0  ;;  %v780_v0 = vld [vmem:[%s1270_s3 + $0x198] sm:$0xff] }
  0x13   :  { %122 = vmatpush.msra.mxu0 %v709_v25  ;;  %163 = vmatpush.msra.mxu1 %v71_v26  ;;  %277 = vst.msk [vmem:[#allocation3 + $0x18] sm:$0xff] %vm275_vm9, %v798_v2  ;;  %v345_v26 = vld [vmem:[%s1270_s3 + $0x38] sm:$0xff] }
  0x14   :  { %216 = vmatpush.msra.mxu2 %v728_v29  ;;  %256 = vst.msk [vmem:[#allocation3] ss:$8 sm:$0x3] %vm999_vm8, %v798_v2  ;;  %431 = vmatpush.msra.mxu3 %v752_v9 }
  0x15   :  { %497 = vmatpush.msrb.mxu1 %v353_v58  ;;  %268 = vst.msk [vmem:[#allocation3] sm:$0xff] %vm267_vm7, %v798_v2  ;;  %v756_v58 = vld [vmem:[%s1270_s3 + $0x118] sm:$0xff] }
  0x16   :  { %217 = vmatpush.msra.mxu2 %v727_v30  ;;  %276 = vst.msk [vmem:[#allocation3 + $0x8] sm:$0xff] %vm275_vm9, %v798_v2  ;;  %432 = vmatpush.msra.mxu3 %v751_v14 }
  0x17   :  { %498 = vmatpush.msrb.mxu1 %v352_v59  ;;  %259 = vst.msk [vmem:[#allocation3 + $0x30] ss:$8 sm:$0x3] %vm999_vm8, %v798_v2  ;;  %472 = vmatpush.msrb.mxu0 %v756_v58  ;;  %v741_v59 = vld [vmem:[%s1270_s3 + $0xa0] sm:$0xff] }
  0x18   :  { %218 = vmatpush.msra.mxu2 %v726_v31  ;;  %262 = vst.msk [vmem:[#allocation3 + $0x21] ss:$8 sm:$0x3] %vm999_vm8, %v798_v2  ;;  %433 = vmatpush.msra.mxu3 %v750_v17  ;;  %v344_v31 = vld [vmem:[%s1270_s3 + $0x30] sm:$0xff] }
  0x19   :  { %499 = vmatpush.msrb.mxu1 %v351_v62  ;;  %265 = vst.msk [vmem:[#allocation3 + $0x51] ss:$8 sm:$0x3] %vm999_vm8, %v798_v2  ;;  %v755_v62 = vld [vmem:[%s1270_s3 + $0x110] sm:$0xff] }
  0x1a   :  { %281 = vst.msk [vmem:[#allocation3 + $0x48] sm:$0xff] %vm275_vm9, %v798_v2  ;;  %434 = vmatpush.msra.mxu3 %v749_v21  ;;  %473 = vmatpush.msrb.mxu0 %v755_v62  ;;  %v772_v21 = vld [vmem:[%s1270_s3 + $0x158] sm:$0xff] }
  0x1b   :  { %500 = vmatpush.msrb.mxu1 %v350_v6  ;;  %272 = vst.msk [vmem:[#allocation3 + $0x30] sm:$0xff] %vm267_vm7, %v798_v2  ;;  %v777_v6 = vld [vmem:[%s1270_s3 + $0x180] sm:$0xff] }
  0x1c   :  { %280 = vst.msk [vmem:[#allocation3 + $0x38] sm:$0xff] %vm275_vm9, %v798_v2 }
  0x1d   :  { %501 = vmatpush.msrb.mxu1 %v349_v12  ;;  %271 = vst.msk [vmem:[#allocation3 + $0x20] sm:$0x3] %vm270_vm11, %v798_v2 }
  0x1e   :  { %279 = vst.msk [vmem:[#allocation3 + $0x28] sm:$0x3] %vm278_vm12, %v798_v2 }
  0x1f   :  { %502 = vmatpush.msrb.mxu1 %v348_v15  ;;  %274 = vst.msk [vmem:[#allocation3 + $0x50] sm:$0x3] %vm270_vm11, %v798_v2 }
  0x20   :  { %282 = vst.msk [vmem:[#allocation3 + $0x58] sm:$0x3] %vm278_vm12, %v798_v2 }
  0x21   :  { %503 = vmatpush.msrb.mxu1 %v347_v18 }
  0x23   :  { %504 = vmatpush.msrb.mxu1 %v346_v23  ;;  %v770_v23 = vld [vmem:[%s1270_s3 + $0x148] sm:$0xff] }
  0x25   :  { %505 = vmatpush.msrb.mxu1 %v345_v26  ;;  %v782_v26 = vld [vmem:[%s1270_s3 + $0x1a8] sm:$0xff] }
  0x27   :  { %506 = vmatpush.msrb.mxu1 %v344_v31 }
  0x74   :  { %v50_v32 = vpop.permute.xlu0 %49  ;;  %v54_v33 = vpop.permute.xlu1 %53 }
  0x75   :  { %62 = vst.msk [vmem:[#allocation2 + $0x1] sm:$0xff] %vm61_vm5, %v50_v32 }
  0x76   :  { %64 = vst.msk [vmem:[#allocation2 + $0x19] sm:$0xff] %vm61_vm5, %v54_v33  ;;  %v343_v33 = vld [vmem:[%s1270_s3 + $0x28] sm:$0xff] }
  0x77   :  { %507 = vmatpush.msrb.mxu1 %v343_v33 }
  0x7c   :  { %v52_v34 = vpop.permute.xlu0 %51  ;;  %v80_v35 = vld [vmem:[#allocation2 + $0x1] sm:$0xff]  ;;  %v56_v37 = vpop.permute.xlu1 %55 }
  0x7d   :  { %v66_v36 = vld [vmem:[#allocation2] sm:$0xff]  ;;  %63 = vst.msk [vmem:[#allocation2 + $0x9] sm:$0xff] %vm61_vm5, %v52_v34  ;;  %718 = vmatmul.msk.f32.vlgmr.msra.gmra.mxu0 %vm94_vm6, %v80_v35  ;;  %v69_v42 = vld [vmem:[#allocation2 + $0x18] sm:$0xff] }
  0x7e   :  { %722 = vmatmul.msk.f32.vlgmr.msra.gmra.mxu1 %vm94_vm6, %v66_v36  ;;  %65 = vst.msk [vmem:[#allocation2 + $0x21] sm:$0xff] %vm61_vm5, %v56_v37  ;;  %v82_v41 = vld [vmem:[#allocation2 + $0x19] sm:$0xff]  ;;  %666 = vmatpush.msra.mxu0 %v782_v26 }
  0x7f   :  { %v342_v37 = vld [vmem:[%s1270_s3 + $0x20] sm:$0xff] }
  0x80   :  { %508 = vmatpush.msrb.mxu1 %v342_v37 }
  0x84   :  { %v81_v38 = vld [vmem:[#allocation2 + $0x9] sm:$0xff] }
  0x85   :  { %v67_v39 = vld [vmem:[#allocation2 + $0x8] sm:$0xff]  ;;  %719 = vmatmul.msk.f32.gmra.mxu0 %vm94_vm6, %v81_v38  ;;  %v70_v45 = vld [vmem:[#allocation2 + $0x20] sm:$0xff] }
  0x86   :  { %v177_v40 = vld [vmem:[#allocation2 + $0x2] sm:$0xff]  ;;  %723 = vmatmul.msk.f32.gmra.mxu1 %vm94_vm6, %v67_v39  ;;  %v178_v43 = vld [vmem:[#allocation2 + $0xa] sm:$0xff]  ;;  %v179_v46 = vld [vmem:[#allocation2 + $0x1a] sm:$0xff] }
  0x87   :  { %735 = vmatmul.msk.f32.vlgmr.msra.gmra.mxu2 %vm94_vm6, %v177_v40  ;;  %v83_v44 = vld [vmem:[#allocation2 + $0x21] sm:$0xff] }
  0x88   :  { %v180_v47 = vld [vmem:[#allocation2 + $0x22] sm:$0xff] }
  0x8d   :  { %720 = vmatmul.msk.f32.gmra.mxu0 %vm94_vm6, %v82_v41 }
  0x8e   :  { %724 = vmatmul.msk.f32.gmra.mxu1 %vm94_vm6, %v69_v42 }
  0x8f   :  { %736 = vmatmul.msk.f32.gmra.mxu2 %vm94_vm6, %v178_v43 }
  0x95   :  { %721 = vmatmul.msk.f32.gmra.mxu0 %vm94_vm6, %v83_v44 }
  0x96   :  { %725 = vmatmul.msk.f32.gmra.mxu1 %vm94_vm6, %v70_v45  ;;  %v748_v45 = vld [vmem:[%s1270_s3 + $0xd8] sm:$0xff] }
  0x97   :  { %737 = vmatmul.msk.f32.gmra.mxu2 %vm94_vm6, %v179_v46  ;;  %v341_v46 = vld [vmem:[%s1270_s3 + $0x18] sm:$0xff]  ;;  %435 = vmatpush.msra.mxu3 %v748_v45 }
  0x98   :  { %509 = vmatpush.msrb.mxu1 %v341_v46 }
  0x9f   :  { %738 = vmatmul.msk.f32.gmra.mxu2 %vm94_vm6, %v180_v47  ;;  %v747_v47 = vld [vmem:[%s1270_s3 + $0xd0] sm:$0xff] }
  0xa0   :  { %436 = vmatpush.msra.mxu3 %v747_v47 }
  0xfa   :  { %v124_v48 = vpop.f32.mrf.mxu0 }
  0xfb   :  { %v165_v49 = vpop.f32.mrf.mxu1 }
  0xfc   :  { %v166_v50 = vadd.f32 %v165_v49, %v124_v48  ;;  %v340_v48 = vld [vmem:[%s1270_s3 + $0x10] sm:$0xff]  ;;  %v746_v49 = vld [vmem:[%s1270_s3 + $0xc8] sm:$0xff] }
  0xfd   :  { %510 = vmatpush.msrb.mxu1 %v340_v48  ;;  %437 = vmatpush.msra.mxu3 %v746_v49 }
 0x102   :  { %v127_v51 = vpop.f32.mrf.mxu0 }
 0x103   :  { %v168_v53 = vpop.f32.mrf.mxu1 }
 0x104   :  { %v169_v3 = vadd.f32 %v168_v53, %v127_v51  ;;  %v355_v51 = vld [vmem:[%s1270_s3 + $0x88] sm:$0xff]  ;;  %v745_v53 = vld [vmem:[%s1270_s3 + $0xc0] sm:$0xff] }
 0x105   :  { %540 = vmatpush.msrb.mxu2 %v355_v51  ;;  %438 = vmatpush.msra.mxu3 %v745_v53 }
 0x10a   :  { %v220_v54 = vpop.f32.mrf.mxu2  ;;  %v130_v10 = vpop.f32.mrf.mxu0 }
 0x10b   :  { %v232_v55 = vadd.f32 %v220_v54, %v166_v50  ;;  %v171_v11 = vpop.f32.mrf.mxu1  ;;  %v339_v50 = vld [vmem:[%s1270_s3 + $0x8] sm:$0xff]  ;;  %v338_v54 = vld [vmem:[%s1270_s3] sm:$0xff] }
 0x10c   :  { %v172_v19 = vadd.f32 %v171_v11, %v130_v10  ;;  %511 = vmatpush.msrb.mxu1 %v339_v50  ;;  %v774_v10 = vld [vmem:[%s1270_s3 + $0x168] sm:$0xff] }
 0x10d   :  { %v238_v57 = vmul.f32 %v973_v52, %v232_v55  ;;  %v744_v55 = vld [vmem:[%s1270_s3 + $0xb8] sm:$0xff] }
 0x10e   :  { %512 = vmatpush.msrb.mxu1 %v338_v54  ;;  %439 = vmatpush.msra.mxu3 %v744_v55 }
 0x10f   :  { %v244_v61 = vadd.f32 %v978_v56, %v238_v57  ;;  %v742_v57 = vld [vmem:[%s1270_s3 + $0xa8] sm:$0xff] }
 0x110   :  { %787 = vmatpush.msra.mxu1 %v782_v26 }
 0x111   :  { %v248_v4 = vmax.f32 %v244_v61, 0.0  ;;  %v739_v61 = vld [vmem:[%s1270_s3 + $0x90] sm:$0xff] }
 0x112   :  { %v223_v5 = vpop.f32.mrf.mxu2  ;;  %v133_v29 = vpop.f32.mrf.mxu0 }
 0x113   :  { %v233_v7 = vadd.f32 %v223_v5, %v169_v3  ;;  %v288_v8 = vrot.slane %v248_v4, 7  ;;  %v174_v30 = vpop.f32.mrf.mxu1  ;;  %v778_v3 = vld [vmem:[%s1270_s3 + $0x188] sm:$0xff] }
 0x114   :  { %v175_v34 = vadd.f32 %v174_v30, %v133_v29  ;;  %v781_v29 = vld [vmem:[%s1270_s3 + $0x1a0] sm:$0xff]  ;;  %v766_v30 = vld [vmem:[%s1270_s3 + $0x128] sm:$0xff] }
 0x115   :  { %v239_v13 = vmul.f32 %v973_v52, %v233_v7  ;;  %294 = vrot.lane.b32.xlu2 %v288_v8, %s800_s0  ;;  %v776_v7 = vld [vmem:[%s1270_s3 + $0x178] sm:$0xff]  ;;  %789 = vmatpush.msra.mxu1 %v781_v29 }
 0x116   :  { %667 = vmatpush.msra.mxu0 %v781_v29 }
 0x117   :  { %v245_v16 = vadd.f32 %v978_v56, %v239_v13 }
 0x119   :  { %v249_v20 = vmax.f32 %v245_v16, 0.0  ;;  %v773_v16 = vld [vmem:[%s1270_s3 + $0x160] sm:$0xff] }
 0x11a   :  { %v226_v22 = vpop.f32.mrf.mxu2 }
 0x11b   :  { %v234_v24 = vadd.f32 %v226_v22, %v172_v19  ;;  %v289_v25 = vrot.slane %v249_v20, 7  ;;  %v771_v22 = vld [vmem:[%s1270_s3 + $0x150] sm:$0xff] }
 0x11d   :  { %v240_v27 = vmul.f32 %v973_v52, %v234_v24  ;;  %298 = vrot.lane.b32.xlu0 %v289_v25, %s800_s0  ;;  %v290_v28 = vsel %vm287_vm10, %v288_v8, %v289_v25  ;;  %v775_v8 = vld [vmem:[%s1270_s3 + $0x170] sm:$0xff]  ;;  %v769_v25 = vld [vmem:[%s1270_s3 + $0x140] sm:$0xff] }
 0x11e   :  { %296 = vrot.lane.b32.xlu2 %v290_v28, %s800_s0  ;;  %v767_v28 = vld [vmem:[%s1270_s3 + $0x130] sm:$0xff] }
 0x11f   :  { %v246_v32 = vadd.f32 %v978_v56, %v240_v27  ;;  %v768_v27 = vld [vmem:[%s1270_s3 + $0x138] sm:$0xff] }
 0x121   :  { %v250_v35 = vmax.f32 %v246_v32, 0.0  ;;  %v765_v32 = vld [vmem:[%s1270_s3 + $0x120] sm:$0xff] }
 0x122   :  { %v229_v36 = vpop.f32.mrf.mxu2 }
 0x123   :  { %v235_v38 = vadd.f32 %v229_v36, %v175_v34  ;;  %v291_v39 = vrot.slane %v250_v35, 7 }
 0x125   :  { %v241_v40 = vmul.f32 %v973_v52, %v235_v38  ;;  %300 = vrot.lane.b32.xlu1 %v291_v39, %s800_s0  ;;  %v354_v52 = vld [vmem:[%s1270_s3 + $0x80] sm:$0xff] }
 0x126   :  { %541 = vmatpush.msrb.mxu2 %v354_v52 }
 0x127   :  { %v247_v41 = vadd.f32 %v978_v56, %v241_v40  ;;  %v743_v56 = vld [vmem:[%s1270_s3 + $0xb0] sm:$0xff] }
 0x128   :  { %440 = vmatpush.msra.mxu3 %v743_v56  ;;  %788 = vmatpush.msra.mxu2 %v782_v26 }
 0x129   :  { %v251_v42 = vmax.f32 %v247_v41, 0.0 }
 0x12a   :  { %441 = vmatpush.msra.mxu3 %v742_v57  ;;  %790 = vmatpush.msra.mxu2 %v781_v29 }
 0x12b   :  { %v292_v43 = vrot.slane %v251_v42, 7 }
 0x12c   :  { %442 = vmatpush.msra.mxu3 %v741_v59 }
 0x12d   :  { %304 = vrot.lane.b32.xlu0 %v292_v43, %s800_s0  ;;  %v293_v44 = vsel %vm287_vm10, %v291_v39, %v292_v43 }
 0x12e   :  { %302 = vrot.lane.b32.xlu2 %v293_v44, %s800_s0  ;;  %443 = vmatpush.msra.mxu3 %v740_v60 }
 0x130   :  { %444 = vmatpush.msra.mxu3 %v739_v61 }
 0x132   :  { %623 = vmatpush.msrb.mxu3 %v780_v0 }
 0x134   :  { %624 = vmatpush.msrb.mxu3 %v779_v1 }
 0x136   :  { %625 = vmatpush.msrb.mxu3 %v778_v3 }
 0x138   :  { %626 = vmatpush.msrb.mxu3 %v777_v6 }
 0x13a   :  { %627 = vmatpush.msrb.mxu3 %v776_v7 }
 0x13c   :  { %628 = vmatpush.msrb.mxu3 %v775_v8 }
 0x13e   :  { %629 = vmatpush.msrb.mxu3 %v774_v10 }
 0x140   :  { %630 = vmatpush.msrb.mxu3 %v773_v16 }
 0x142   :  { %631 = vmatpush.msrb.mxu3 %v772_v21 }
 0x144   :  { %632 = vmatpush.msrb.mxu3 %v771_v22 }
 0x146   :  { %633 = vmatpush.msrb.mxu3 %v770_v23 }
 0x148   :  { %634 = vmatpush.msrb.mxu3 %v769_v25 }
 0x14a   :  { %635 = vmatpush.msrb.mxu3 %v768_v27 }
 0x14c   :  { %636 = vmatpush.msrb.mxu3 %v767_v28 }
 0x14e   :  { %637 = vmatpush.msrb.mxu3 %v766_v30 }
 0x150   :  { %638 = vmatpush.msrb.mxu3 %v765_v32 }
 0x16f   :  { %v295_v63 = vpop.permute.xlu2 %294 }
 0x170   :  { %313 = vst.msk [vmem:[#allocation3] sm:$0xfe] %vm312_vm13, %v295_v63 }
 0x171   :  { %315 = vst.msk [vmem:[#allocation3 + $0x8] sm:$0xfe] %vm314_vm14, %v295_v63 }
 0x177   :  { %v329_v2 = vld [vmem:[#allocation3] sm:$0xff] }
 0x178   :  { %513 = vmatmul.f32.vlgmr.msrb.gmra.mxu1 %v329_v2  ;;  %v330_v4 = vld [vmem:[#allocation3 + $0x8] sm:$0xff]  ;;  %v297_v5 = vpop.permute.xlu2 %296  ;;  %v356_v9 = vld [vmem:[#allocation3] sm:$0xfe] }
 0x179   :  { %761 = vmatmul.msk.f32.vlgmr.msrb.gmra.mxu2 %vm420_vm15, %v330_v4  ;;  %317 = vst.msk [vmem:[#allocation3 + $0x10] sm:$0xff] %vm316_vm0, %v297_v5  ;;  %v357_v11 = vld [vmem:[#allocation3 + $0x8] sm:$0xfe]  ;;  %v371_v15 = vrot.slane %v356_v9, 1  ;;  %v555_v0 = vld [vmem:[#allocation3] sm:$0xfc] }
 0x17a   :  { %318 = vst.msk [vmem:[#allocation3 + $0x18] sm:$0xff] %vm267_vm7, %v297_v5  ;;  %v374_v18 = vrot.slane %v357_v11, 1  ;;  %v556_v2 = vld [vmem:[#allocation3 + $0x8] sm:$0xfc]  ;;  %v568_v6 = vrot.slane %v555_v0, 2 }
 0x17b   :  { %v571_v8 = vrot.slane %v556_v2, 2 }
 0x180   :  { %v1166_v12 = vld [vmem:[#allocation3 + $0x10] sm:$0xff] }
 0x181   :  { %v372_v13 = vrot.slane %v1166_v12, 1  ;;  %516 = vmatmul.f32.gmra.mxu1 %v1166_v12  ;;  %v1170_v14 = vld [vmem:[#allocation3 + $0x18] sm:$0xff]  ;;  %v569_v1 = vrot.slane %v1166_v12, 2 }
 0x182   :  { %v375_v17 = vrot.slane %v1170_v14, 1  ;;  %762 = vmatmul.msk.f32.gmra.mxu2 %vm420_vm15, %v1170_v14  ;;  %v572_v63 = vrot.slane %v1170_v14, 2 }
 0x183   :  { %v373_v19 = vsel %vm370_vm1, %v371_v15, %v372_v13  ;;  %v570_v9 = vsel %vm567_vm4, %v568_v6, %v569_v1 }
 0x184   :  { %445 = vmatmul.f32.vlgmr.msra.gmra.mxu3 %v373_v19  ;;  %v376_v20 = vsel %vm370_vm1, %v374_v18, %v375_v17  ;;  %v573_v10 = vsel %vm567_vm4, %v571_v8, %v572_v63 }
 0x185   :  { %757 = vmatmul.msk.f32.vlgmr.msrb.gmra.mxu0 %vm420_vm15, %v376_v20 }
 0x188   :  { %v303_v24 = vpop.permute.xlu2 %302 }
 0x189   :  { %325 = vst.msk [vmem:[#allocation3 + $0x40] sm:$0xff] %vm316_vm0, %v303_v24 }
 0x18a   :  { %326 = vst.msk [vmem:[#allocation3 + $0x48] sm:$0xff] %vm267_vm7, %v303_v24 }
 0x18f   :  { %v299_v31 = vpop.permute.xlu0 %298 }
 0x190   :  { %320 = vst.msk [vmem:[#allocation3 + $0x20] sm:$0x1] %vm319_vm2, %v299_v31  ;;  %v1220_v40 = vld [vmem:[#allocation3 + $0x40] sm:$0xff] }
 0x191   :  { %322 = vst.msk [vmem:[#allocation3 + $0x28] sm:$0x1] %vm321_vm3, %v299_v31  ;;  %v337_v41 = vld [vmem:[#allocation3 + $0x48] sm:$0xff]  ;;  %v390_v45 = vrot.slane %v1220_v40, 1  ;;  %v585_v18 = vrot.slane %v1220_v40, 2 }
 0x192   :  { %v393_v50 = vrot.slane %v337_v41, 1  ;;  %v588_v3 = vrot.slane %v337_v41, 2 }
 0x197   :  { %v301_v33 = vpop.permute.xlu1 %300  ;;  %v358_v34 = vld [vmem:[#allocation3 + $0x20] sm:$0x1] }
 0x198   :  { %323 = vst.msk [vmem:[#allocation3 + $0x30] sm:$0xfe] %vm312_vm13, %v301_v33  ;;  %v377_v35 = vrot.slane %v358_v34, 1  ;;  %v359_v36 = vld [vmem:[#allocation3 + $0x28] sm:$0x1] }
 0x199   :  { %324 = vst.msk [vmem:[#allocation3 + $0x38] sm:$0xfe] %vm314_vm14, %v301_v33  ;;  %v379_v37 = vrot.slane %v359_v36, 1  ;;  %v558_v56 = vld [vmem:[#allocation3 + $0x28] sm:$0x3] }
 0x19a   :  { %v378_v38 = vsel %vm370_vm1, %v372_v13, %v377_v35  ;;  %v576_v61 = vrot.slane %v558_v56, 2  ;;  %v557_v12 = vld [vmem:[#allocation3 + $0x20] sm:$0x3] }
 0x19b   :  { %448 = vmatmul.f32.gmra.mxu3 %v378_v38  ;;  %v380_v39 = vsel %vm370_vm1, %v375_v17, %v379_v37  ;;  %v574_v13 = vrot.slane %v557_v12, 2 }
 0x19c   :  { %758 = vmatmul.msk.f32.gmra.mxu0 %vm420_vm15, %v380_v39  ;;  %v577_v4 = vsel %vm567_vm4, %v572_v63, %v576_v61 }
 0x19d   :  { %v575_v15 = vsel %vm567_vm4, %v569_v1, %v574_v13 }
 0x19f   :  { %v305_v42 = vpop.permute.xlu0 %304  ;;  %v334_v43 = vld [vmem:[#allocation3 + $0x30] sm:$0xff] }
 0x1a0   :  { %v360_v44 = vld [vmem:[#allocation3 + $0x30] sm:$0xfe]  ;;  %327 = vst.msk [vmem:[#allocation3 + $0x50] sm:$0x1] %vm319_vm2, %v305_v42  ;;  %519 = vmatmul.f32.gmra.mxu1 %v334_v43  ;;  %v335_v46 = vld [vmem:[#allocation3 + $0x38] sm:$0xff] }
 0x1a1   :  { %v389_v47 = vrot.slane %v360_v44, 1  ;;  %v361_v48 = vld [vmem:[#allocation3 + $0x38] sm:$0xfe]  ;;  %328 = vst.msk [vmem:[#allocation3 + $0x58] sm:$0x1] %vm321_vm3, %v305_v42  ;;  %763 = vmatmul.msk.f32.gmra.mxu2 %vm420_vm15, %v335_v46 }
 0x1a2   :  { %v392_v49 = vrot.slane %v361_v48, 1  ;;  %v560_v7 = vld [vmem:[#allocation3 + $0x38] sm:$0xfc]  ;;  %v559_v16 = vld [vmem:[#allocation3 + $0x30] sm:$0xfc] }
 0x1a3   :  { %v391_v51 = vsel %vm370_vm1, %v389_v47, %v390_v45  ;;  %v587_v11 = vrot.slane %v560_v7, 2  ;;  %v584_v17 = vrot.slane %v559_v16, 2  ;;  %v796_v44 = vld [vmem:[%s1271_s4] ss:$0 sm:$0xff]  ;;  %v797_v46 = vld [vmem:[%s1271_s4 + $0x1] ss:$0 sm:$0xff] }
 0x1a4   :  { %451 = vmatmul.f32.gmra.mxu3 %v391_v51  ;;  %v394_v52 = vsel %vm370_vm1, %v392_v49, %v393_v50 }
 0x1a5   :  { %759 = vmatmul.msk.f32.gmra.mxu0 %vm420_vm15, %v394_v52  ;;  %v589_v14 = vsel %vm567_vm4, %v587_v11, %v588_v3  ;;  %v586_v19 = vsel %vm567_vm4, %v584_v17, %v585_v18 }
 0x1a7   :  { %v362_v53 = vld [vmem:[#allocation3 + $0x50] sm:$0x1] }
 0x1a8   :  { %522 = vmatmul.f32.gmra.mxu1 %v1220_v40  ;;  %v395_v54 = vrot.slane %v362_v53, 1  ;;  %v363_v55 = vld [vmem:[#allocation3 + $0x58] sm:$0x1]  ;;  %v561_v20 = vld [vmem:[#allocation3 + $0x50] sm:$0x3] }
 0x1a9   :  { %764 = vmatmul.msk.f32.gmra.mxu2 %vm420_vm15, %v337_v41  ;;  %v397_v57 = vrot.slane %v363_v55, 1  ;;  %v562_v58 = vld [vmem:[#allocation3 + $0x58] sm:$0x3]  ;;  %v590_v21 = vrot.slane %v561_v20, 2 }
 0x1aa   :  { %v396_v59 = vsel %vm370_vm1, %v390_v45, %v395_v54  ;;  %v592_v62 = vrot.slane %v562_v58, 2 }
 0x1ab   :  { %v398_v60 = vsel %vm370_vm1, %v393_v50, %v397_v57  ;;  %v591_v22 = vsel %vm567_vm4, %v585_v18, %v590_v21 }
 0x1ac   :  { %454 = vmatmul.f32.gmra.mxu3 %v396_v59  ;;  %v593_v5 = vsel %vm567_vm4, %v588_v3, %v592_v62 }
 0x1ad   :  { %760 = vmatmul.msk.f32.gmra.mxu0 %vm420_vm15, %v398_v60 }
 0x1b0   :  { %784 = vmatmul.msk.f32.vlgmr.msra.gmra.mxu1 %vm420_vm15, %v577_v4 }
 0x1b1   :  { %786 = vmatmul.msk.f32.vlgmr.msra.gmra.mxu2 %vm420_vm15, %v593_v5 }
 0x1b4   :  { %639 = vmatmul.f32.vlgmr.msrb.gmra.mxu3 %v570_v9 }
 0x1b5   :  { %783 = vmatmul.msk.f32.vlgmr.msra.gmra.mxu0 %vm420_vm15, %v573_v10 }
 0x1b8   :  { %785 = vmatmul.msk.f32.gmra.mxu1 %vm420_vm15, %v589_v14 }
 0x1bc   :  { %642 = vmatmul.f32.gmra.mxu3 %v575_v15 }
 0x1c4   :  { %645 = vmatmul.f32.gmra.mxu3 %v586_v19 }
 0x1cc   :  { %648 = vmatmul.f32.gmra.mxu3 %v591_v22 }
 0x1f5   :  { %v514_v24 = vpop.f32.mrf.mxu1 }
 0x1fc   :  { %v543_v31 = vpop.f32.mrf.mxu2 }
 0x1fe   :  { %v517_v28 = vpop.f32.mrf.mxu1 }
 0x202   :  { %v475_v23 = vpop.f32.mrf.mxu0 }
 0x205   :  { %v546_v36 = vpop.f32.mrf.mxu2 }
 0x207   :  { %v446_v25 = vpop.f32.mrf.mxu3 }
 0x208   :  { %v476_v35 = vadd.f32 %v475_v23, %v446_v25 }
 0x20a   :  { %v515_v38 = vadd.f32 %v514_v24, %v476_v35 }
 0x20c   :  { %v544_v42 = vadd.f32 %v543_v31, %v515_v38 }
 0x219   :  { %v478_v26 = vpop.f32.mrf.mxu0 }
 0x21d   :  { %v520_v32 = vpop.f32.mrf.mxu1 }
 0x21e   :  { %v449_v27 = vpop.f32.mrf.mxu3 }
 0x21f   :  { %v479_v41 = vadd.f32 %v478_v26, %v449_v27 }
 0x221   :  { %v518_v48 = vadd.f32 %v517_v28, %v479_v41 }
 0x222   :  { %v481_v29 = vpop.f32.mrf.mxu0 }
 0x223   :  { %v547_v55 = vadd.f32 %v546_v36, %v518_v48 }
 0x224   :  { %v549_v47 = vpop.f32.mrf.mxu2 }
 0x225   :  { %v523_v37 = vpop.f32.mrf.mxu1 }
 0x227   :  { %v452_v30 = vpop.f32.mrf.mxu3 }
 0x228   :  { %v482_v53 = vadd.f32 %v481_v29, %v452_v30 }
 0x22a   :  { %v484_v33 = vpop.f32.mrf.mxu0  ;;  %v521_v58 = vadd.f32 %v520_v32, %v482_v53 }
 0x22c   :  { %v552_v60 = vpop.f32.mrf.mxu2  ;;  %v550_v3 = vadd.f32 %v549_v47, %v521_v58 }
 0x22d   :  { %v672_v50 = vpop.f32.mrf.mxu1 }
 0x22f   :  { %v455_v34 = vpop.f32.mrf.mxu3 }
 0x230   :  { %v485_v0 = vadd.f32 %v484_v33, %v455_v34 }
 0x232   :  { %v669_v39 = vpop.f32.mrf.mxu0  ;;  %v524_v5 = vadd.f32 %v523_v37, %v485_v0 }
 0x234   :  { %v678_v8 = vpop.f32.mrf.mxu2  ;;  %v553_v11 = vadd.f32 %v552_v60, %v524_v5 }
 0x235   :  { %v675_v62 = vpop.f32.mrf.mxu1 }
 0x237   :  { %v640_v40 = vpop.f32.mrf.mxu3 }
 0x238   :  { %v670_v43 = vadd.f32 %v669_v39, %v640_v40 }
 0x23a   :  { %v681_v45 = vadd.f32 %v670_v43, %v544_v42 }
 0x23c   :  { %v687_v49 = vmul.f32 %v796_v44, %v681_v45 }
 0x23e   :  { %v693_v51 = vadd.f32 %v797_v46, %v687_v49 }
 0x23f   :  { %v643_v52 = vpop.f32.mrf.mxu3 }
 0x240   :  { %v697_v54 = vmax.f32 %v693_v51, 0.0  ;;  %v673_v56 = vadd.f32 %v672_v50, %v643_v52 }
 0x242   :  { %701 = vst [vmem:[%s1272_s5] sm:$0xff] %v697_v54  ;;  %v682_v57 = vadd.f32 %v673_v56, %v547_v55 }
 0x244   :  { %v688_v59 = vmul.f32 %v796_v44, %v682_v57 }
 0x246   :  { %v694_v61 = vadd.f32 %v797_v46, %v688_v59 }
 0x247   :  { %v646_v63 = vpop.f32.mrf.mxu3 }
 0x248   :  { %v698_v1 = vmax.f32 %v694_v61, 0.0  ;;  %v676_v2 = vadd.f32 %v675_v62, %v646_v63 }
 0x24a   :  { %702 = vst [vmem:[%s1272_s5 + $0x8] sm:$0xff] %v698_v1  ;;  %v683_v4 = vadd.f32 %v676_v2, %v550_v3 }
 0x24c   :  { %v689_v6 = vmul.f32 %v796_v44, %v683_v4 }
 0x24e   :  { %v695_v7 = vadd.f32 %v797_v46, %v689_v6 }
 0x24f   :  { %v649_v9 = vpop.f32.mrf.mxu3 }
 0x250   :  { %v699_v10 = vmax.f32 %v695_v7, 0.0  ;;  %v679_v12 = vadd.f32 %v678_v8, %v649_v9 }
 0x252   :  { %703 = vst [vmem:[%s1272_s5 + $0x10] sm:$0xff] %v699_v10  ;;  %v684_v13 = vadd.f32 %v679_v12, %v553_v11 }
 0x254   :  { %v690_v14 = vmul.f32 %v796_v44, %v684_v13 }
 0x256   :  { %v696_v15 = vadd.f32 %v797_v46, %v690_v14 }
 0x258   :  { %v700_v16 = vmax.f32 %v696_v15, 0.0 }
 0x25a   :  { %704 = vst [vmem:[%s1272_s5 + $0x18] sm:$0xff] %v700_v16 }

</bundles_post_ra>
